<compile_context>
chip_gen: v7x
topology: tpu7x:2x2x1
jax: 0.10.0
libtpu: 0.0.40
codegen_flags: <defaults>
</compile_context>

<pallas_src>
import functools

import jax
import jax.numpy as jnp
from jax.experimental import pallas as pl
from jax.experimental.pallas import tpu as pltpu

EPS = 1e-4  # module's self.epsilon


def _ffm2_fused_kernel(w0_ref, w1_ref, x0_ref, x1_ref, o_ref):
    # w0/w1: (1, C) f32 normalized weights; x0/x1: (tHW, C) native dtype;
    # o: (2, tHW, C) native dtype (o[0] <- scaled x0 tile, o[1] <- scaled x1 tile).
    x0 = x0_ref[...].astype(jnp.float32)
    x1 = x1_ref[...].astype(jnp.float32)
    o_ref[0] = (x0 * w0_ref[...]).astype(o_ref.dtype)
    o_ref[1] = (x1 * w1_ref[...]).astype(o_ref.dtype)


def _ffm2_split_kernel(w0_ref, w1_ref, x0_ref, x1_ref, o0_ref, o1_ref):
    o0_ref[...] = (x0_ref[...].astype(jnp.float32) * w0_ref[...]).astype(o0_ref.dtype)
    o1_ref[...] = (x1_ref[...].astype(jnp.float32) * w1_ref[...]).astype(o1_ref.dtype)


def ffm_concat2(x0_nchw, x1_nchw, w, *, block_hw=1024):
    N, C1, H, W = x0_nchw.shape
    N2, C2, H2, W2 = x1_nchw.shape
    assert (N, H, W) == (N2, H2, W2)
    HW = H * W
    out_dtype = x0_nchw.dtype

    # Normalized fusion weights: tiny O(C1+C2) op, off the bandwidth-critical
    # path; keep the sum/divide in f32 regardless of I/O dtype.
    w32 = w.astype(jnp.float32)
    wn = w32 / (jnp.sum(w32) + EPS)
    w0 = wn[:C1].reshape(1, C1)
    w1 = wn[C1:C1 + C2].reshape(1, C2)

    # torch .view(N,H,W,C) of contiguous NCHW == free row-major reinterpretation.
    x0v = x0_nchw.reshape(N, HW, C1)
    x1v = x1_nchw.reshape(N, HW, C2)

    # Spatial (sublane) tiling: multiple of 8, a few hundred KiB per operand block.
    t = min(block_hw, HW)
    if t < HW:
        t = max(8, (t // 8) * 8)
    grid = (N, pl.cdiv(HW, t))
    cparams = pltpu.CompilerParams(dimension_semantics=("parallel", "parallel"))

    if C1 == C2:
        # Fused output: (N, 2, HW, C) row-major reshaped to (N, 2C, H, W) is
        # bit-identical to cat([y0, y1], dim=1) -> no XLA concat needed.
        o = pl.pallas_call(
            _ffm2_fused_kernel,
            out_shape=jax.ShapeDtypeStruct((N, 2, HW, C1), out_dtype),
            grid=grid,
            in_specs=[
                pl.BlockSpec((1, C1), lambda n, i: (0, 0)),
                pl.BlockSpec((1, C2), lambda n, i: (0, 0)),
                pl.BlockSpec((None, t, C1), lambda n, i: (n, i, 0)),
                pl.BlockSpec((None, t, C2), lambda n, i: (n, i, 0)),
            ],
            out_specs=pl.BlockSpec((None, 2, t, C1), lambda n, i: (n, 0, i, 0)),
            compiler_params=cparams,
        )(w0, w1, x0v, x1v)
        return o.reshape(N, C1 + C2, H, W)

    # TODO(synk): C1 != C2 -> a fully fused flat output needs manual DMAs
    # (memory_space=pl.ANY); fall back to two outputs + one XLA channel concat.
    o0, o1 = pl.pallas_call(
        _ffm2_split_kernel,
        out_shape=(jax.ShapeDtypeStruct((N, HW, C1), out_dtype),
                   jax.ShapeDtypeStruct((N, HW, C2), out_dtype)),
        grid=grid,
        in_specs=[
            pl.BlockSpec((1, C1), lambda n, i: (0, 0)),
            pl.BlockSpec((1, C2), lambda n, i: (0, 0)),
            pl.BlockSpec((None, t, C1), lambda n, i: (n, i, 0)),
            pl.BlockSpec((None, t, C2), lambda n, i: (n, i, 0)),
        ],
        out_specs=(
            pl.BlockSpec((None, t, C1), lambda n, i: (n, i, 0)),
            pl.BlockSpec((None, t, C2), lambda n, i: (n, i, 0)),
        ),
        compiler_params=cparams,
    )(w0, w1, x0v, x1v)
    return jnp.concatenate([o0.reshape(N, C1, H, W),
                            o1.reshape(N, C2, H, W)], axis=1)


def ffm_concat2_ref(x0, x1, w):
    # Pure-JAX reference with exact PyTorch semantics (view == row-major reshape).
    N, C1, H, W = x0.shape
    _, C2, _, _ = x1.shape
    weight = w / (jnp.sum(w) + EPS)
    y0 = (weight[:C1] * x0.reshape(N, H, W, C1)).reshape(N, C1, H, W)
    y1 = (weight[C1:] * x1.reshape(N, H, W, C2)).reshape(N, C2, H, W)
    return jnp.concatenate([y0, y1], axis=1)


if __name__ == "__main__":
    key = jax.random.PRNGKey(0)
    k0, k1, kw = jax.random.split(key, 3)
    N, C1, C2, H, W = 2, 128, 128, 16, 16

    x0 = jax.random.normal(k0, (N, C1, H, W), dtype=jnp.float32)
    x1 = jax.random.normal(k1, (N, C2, H, W), dtype=jnp.float32)
    # Parameter is torch.ones(C1+C2); perturb slightly so the test is non-trivial.
    w = jnp.ones((C1 + C2,), jnp.float32) \
        + 0.1 * jax.random.normal(kw, (C1 + C2,), dtype=jnp.float32)

    # block_hw=128 exercises the spatial tiling (grid = (N, HW // 128) = (2, 2)).
    fn = jax.jit(functools.partial(ffm_concat2, block_hw=128))
    out = fn(x0, x1, w)
    jax.block_until_ready(out)
    assert out.shape == (N, C1 + C2, H, W)
    assert out.dtype == x0.dtype

    ref = ffm_concat2_ref(x0, x1, w)
    max_err = float(jnp.max(jnp.abs(out - ref)))
    assert jnp.allclose(out, ref, atol=1e-5, rtol=1e-5), max_err

    print("KERNEL_OK")
</pallas_src>

<mosaic_0001>
module attributes {stable_mosaic.version = 11 : i64} {
  func.func @_ffm2_fused_kernel(%arg0: i32, %arg1: i32, %arg2: memref<1x128xf32, #tpu.memory_space<vmem>>, %arg3: memref<1x128xf32, #tpu.memory_space<vmem>>, %arg4: memref<1x128x128xf32, #tpu.memory_space<vmem>>, %arg5: memref<1x128x128xf32, #tpu.memory_space<vmem>>, %arg6: memref<1x2x128x128xf32, #tpu.memory_space<vmem>>) attributes {dimension_semantics = [#tpu.dimension_semantics<parallel>, #tpu.dimension_semantics<parallel>], iteration_bounds = array<i64: 2, 2>, scalar_prefetch = 0 : i64, scratch_operands = 0 : i64, tpu.core_type = #tpu.core_type<tc>, window_params = [{pipeline_mode = #tpu.pipeline_mode<synchronous>, transform_indices = @transform_0, window_bounds = array<i64: 1, 128>}, {pipeline_mode = #tpu.pipeline_mode<synchronous>, transform_indices = @transform_1, window_bounds = array<i64: 1, 128>}, {transform_indices = @transform_2, window_bounds = array<i64: 1, 128, 128>}, {transform_indices = @transform_3, window_bounds = array<i64: 1, 128, 128>}, {transform_indices = @transform_4, window_bounds = array<i64: 1, 2, 128, 128>}]} {
    %c0 = arith.constant 0 : index
    %c0_0 = arith.constant 0 : index
    %c0_1 = arith.constant 0 : index
    %0 = vector.load %arg4[%c0, %c0_0, %c0_1] : memref<1x128x128xf32, #tpu.memory_space<vmem>>, vector<1x128x128xf32>
    %1 = vector.shape_cast %0 : vector<1x128x128xf32> to vector<128x128xf32>
    %c0_2 = arith.constant 0 : index
    %c0_3 = arith.constant 0 : index
    %c0_4 = arith.constant 0 : index
    %2 = vector.load %arg5[%c0_2, %c0_3, %c0_4] : memref<1x128x128xf32, #tpu.memory_space<vmem>>, vector<1x128x128xf32>
    %3 = vector.shape_cast %2 : vector<1x128x128xf32> to vector<128x128xf32>
    %c0_5 = arith.constant 0 : index
    %c0_6 = arith.constant 0 : index
    %4 = vector.load %arg2[%c0_5, %c0_6] : memref<1x128xf32, #tpu.memory_space<vmem>>, vector<1x128xf32>
    %5 = vector.broadcast %4 : vector<1x128xf32> to vector<128x128xf32>
    %6 = arith.mulf %1, %5 : vector<128x128xf32>
    %c0_7 = arith.constant 0 : index
    %c0_8 = arith.constant 0 : index
    %c0_9 = arith.constant 0 : index
    %c0_10 = arith.constant 0 : index
    %7 = vector.load %arg6[%c0_7, %c0_8, %c0_9, %c0_10] : memref<1x2x128x128xf32, #tpu.memory_space<vmem>>, vector<1x1x128x128xf32>
    %8 = vector.shape_cast %7 : vector<1x1x128x128xf32> to vector<128x128xf32>
    %9 = vector.shape_cast %6 : vector<128x128xf32> to vector<1x1x128x128xf32>
    tpu.vector_store %arg6[%c0_7, %c0_8, %c0_9, %c0_10], %9 {strides = array<i32>} : memref<1x2x128x128xf32, #tpu.memory_space<vmem>>, vector<1x1x128x128xf32>,
    %c0_11 = arith.constant 0 : index
    %c0_12 = arith.constant 0 : index
    %10 = vector.load %arg3[%c0_11, %c0_12] : memref<1x128xf32, #tpu.memory_space<vmem>>, vector<1x128xf32>
    %11 = vector.broadcast %10 : vector<1x128xf32> to vector<128x128xf32>
    %12 = arith.mulf %3, %11 : vector<128x128xf32>
    %c0_13 = arith.constant 0 : index
    %c1 = arith.constant 1 : index
    %c0_14 = arith.constant 0 : index
    %c0_15 = arith.constant 0 : index
    %13 = vector.load %arg6[%c0_13, %c1, %c0_14, %c0_15] : memref<1x2x128x128xf32, #tpu.memory_space<vmem>>, vector<1x1x128x128xf32>
    %14 = vector.shape_cast %13 : vector<1x1x128x128xf32> to vector<128x128xf32>
    %15 = vector.shape_cast %12 : vector<128x128xf32> to vector<1x1x128x128xf32>
    tpu.vector_store %arg6[%c0_13, %c1, %c0_14, %c0_15], %15 {strides = array<i32>} : memref<1x2x128x128xf32, #tpu.memory_space<vmem>>, vector<1x1x128x128xf32>,
    return
  }
  func.func @transform_0(%arg0: i32, %arg1: i32) -> (i32, i32) {
    %c0_i32 = arith.constant 0 : i32
    %c0_i32_0 = arith.constant 0 : i32
    %c0_i32_1 = arith.constant 0 : i32
    return %c0_i32, %c0_i32_0 : i32, i32
  }
  func.func @transform_1(%arg0: i32, %arg1: i32) -> (i32, i32) {
    %c0_i32 = arith.constant 0 : i32
    %c0_i32_0 = arith.constant 0 : i32
    %c0_i32_1 = arith.constant 0 : i32
    return %c0_i32, %c0_i32_0 : i32, i32
  }
  func.func @transform_2(%arg0: i32, %arg1: i32) -> (i32, i32, i32) {
    %c0_i32 = arith.constant 0 : i32
    %c0_i32_0 = arith.constant 0 : i32
    return %arg0, %arg1, %c0_i32 : i32, i32, i32
  }
  func.func @transform_3(%arg0: i32, %arg1: i32) -> (i32, i32, i32) {
    %c0_i32 = arith.constant 0 : i32
    %c0_i32_0 = arith.constant 0 : i32
    return %arg0, %arg1, %c0_i32 : i32, i32, i32
  }
  func.func @transform_4(%arg0: i32, %arg1: i32) -> (i32, i32, i32, i32) {
    %c0_i32 = arith.constant 0 : i32
    %c0_i32_0 = arith.constant 0 : i32
    %c0_i32_1 = arith.constant 0 : i32
    return %arg0, %c0_i32, %arg1, %c0_i32_0 : i32, i32, i32, i32
  }
}

</mosaic_0001>

<bundles_post_ra>
// kernel: ffm_concat2.1
= control target key start
LH: loop header
LB: loop body
LE: loop exit
PB: predicated region body
PF: predicated region fallthrough
CT: control target
= control target key end

     0   :  { %s800_s15 = smov 0   ;;  %s802_s16 = smov 0   ;;  %s1058_s0 = inlined_call_operand.vmem [shape: f32[1,128], index: 0, kind: input, shape index: {}]   ;;  %s1059_s1 = inlined_call_operand.vmem [shape: f32[1,128], index: 1, kind: input, shape index: {}]   ;;  %s1060_s2 = inlined_call_operand.vmem [shape: f32[2,256,128], index: 2, kind: input, shape index: {}]   ;;  %s1061_s3 = inlined_call_operand.vmem [shape: f32[2,256,128], index: 3, kind: input, shape index: {}]   ;;  %s1062_s4 = inlined_call_operand.vmem [shape: f32[2,2,256,128], index: 4, kind: output, shape index: {}]  }
   0x1   :  { %s804_s17 = smov 0   ;;  %s806_s18 = smov 0  }
   0x2   :  { %s808_s19 = smov 0   ;;  %s810_s20 = smov 0  }
   0x3   :  { %s812_s21 = smov 0  }
   0x4 LB: > { %s23_s22 = sadd.s32 1, %s765_s19  ;;  %s26_s23 = sadd.s32 1, %s769_s20  ;;  %s773_s21 = sphi %s812_s21, %s14_s21   ;;  %s769_s20 = sphi %s810_s20, %s1069_s20   ;;  %s765_s19 = sphi %s808_s19, %s1068_s19   ;;  %s761_s18 = sphi %s806_s18, %s1067_s18   ;;  %s757_s17 = sphi %s804_s17, %s1066_s17   ;;  %s753_s16 = sphi %s802_s16, %s1065_s16   ;;  %s749_s15 = sphi %s800_s15, %s1064_s15  }
   0x5   : > { %p24_p0 = scmp.ge.s32.totalorder %s23_s22, 2  ;;  %s627_s24 = sadd.s32 4294967295, %s773_s21  }
   0x6   : > { %p143_p1 = scmp.ne.s32.totalorder %s753_s16, %s749_s15  ;;  %p144_p2 = scmp.eq.s32.totalorder %s627_s24, 3 }
   0x7   : > { %s1071_s22 = smov (%p24_p0, %s23_s22), 0  ;;  %s1073_s23 = smov (!%p24_p0, %s26_s23), %s769_s20 }
   0x8   : > { %s129_s25 = ssub.s32 %s765_s19, %s1071_s22  ;;  %p28_p3 = scmp.ge.s32.totalorder %s1073_s23, 2 }
   0x9   : > { %p631_p4 = scmp.ge.s32.totalorder %s773_s21, 1  ;;  %p844_p5 = por %p144_p2, %p143_p1 }
   0xa   : > { %p200_p6 = scmp.lt.s32.totalorder %s773_s21, 5  ;;  %s1075_s23 = smov (%p28_p3, %s1073_s23), 0 }
   0xb   : > { %s128_s27 = ssub.s32 %s769_s20, %s1075_s23  ;;  %s133_s29 = sadd.s32 1, %s753_s16 }
   0xc   : > { %p201_p7 = pnand %p631_p4, %p200_p6  ;;  %s130_s28 = sor.u32 %s129_s25, %s128_s27 }
   0xd   : > { %p131_p8 = scmp.eq.s32.totalorder %s130_s28, 0  ;;  %s857_s5 = sshll.u32 (!%p201_p7), %s757_s17, 4  ;;  %v639_v0 = vld [vmem:[%s1058_s0] ss:$0 sm:$0xff] (!%p201_p7) }
   0xe   : > { %204 = sbr.rel (%p201_p7) target bundleno = 63 (0x3f), region = 36  ;;  %p239_p9 = scmp.lt.s32.totalorder (!%p201_p7), %s761_s18, 1  ;;  %v881_v10 = vld [vmem:[%s1059_s1] ss:$0 sm:$0xff] (!%p201_p7) }
   0xf   : > { %s855_s30 = scalar_select %p131_p8, %s753_s16, %s133_s29  }
  0x10   : > { %s235_s6 = sand.u32 (!%p201_p7), 1, %s749_s15   ;;  %p241_p10 = scmp.lt.s32.totalorder (!%p201_p7), %s857_s5, 31 }
  0x11   : > { %s632_s10 = sshll.u32 (!%p201_p7), %s235_s6, 8 }
  0x15   : > { %s240_s7 = scalar_select %p239_p9, %s761_s18, 1 }
  0x16   : > { %s242_s8 = scalar_select %p241_p10, %s857_s5, 31 }
  0x17   : > { %s634_s9 = sshll.u32 %s240_s7, 5  ;;  %s891_s7 = scalar_lea.vmem [#allocation2], %s632_s10 }
  0x18   : > { %s244_s11 = sadd.s32 %s634_s9, %s242_s8  ;;  %s659_s8 = sshll.u32 (%p844_p5), %s761_s18, 6 }
  0x19   : > { %s635_s12 = sshll.u32 %s244_s11, 3  ;;  %s379_s26 = sadd.s32 (%p844_p5), %s659_s8, %s857_s5 }
  0x1a   : > { %s870_s25 = scalar_lea.vmem %s1060_s2, %s635_s12  ;;  %s889_s6 = scalar_lea.vmem %s1061_s3, %s635_s12 }
  0x1b   : > { %v259_v1 = vld [vmem:[%s870_s25] sm:$0xff]  ;;  %v260_v2 = vld [vmem:[%s870_s25 + $0x8] sm:$0xff]  ;;  %v261_v3 = vld [vmem:[%s870_s25 + $0x10] sm:$0xff]  ;;  %s660_s9 = sshll.u32 (%p844_p5), %s379_s26, 3 }
  0x1c   : > { %v298_v4 = vmul.f32 %v639_v0, %v259_v1  ;;  %v299_v5 = vmul.f32 %v639_v0, %v260_v2  ;;  %v300_v6 = vmul.f32 %v639_v0, %v261_v3  ;;  %v262_v7 = vld [vmem:[%s870_s25 + $0x18] sm:$0xff]  ;;  %v263_v8 = vld [vmem:[%s870_s25 + $0x20] sm:$0xff]  ;;  %v264_v9 = vld [vmem:[%s870_s25 + $0x28] sm:$0xff]  ;;  %s980_s12 = scalar_lea.vmem (%p844_p5), %s1062_s4, %s660_s9 }
  0x1d   : > { %v301_v11 = vmul.f32 %v639_v0, %v262_v7  ;;  %v302_v12 = vmul.f32 %v639_v0, %v263_v8  ;;  %v303_v13 = vmul.f32 %v639_v0, %v264_v9  ;;  %v265_v14 = vld [vmem:[%s870_s25 + $0x30] sm:$0xff]  ;;  %v266_v15 = vld [vmem:[%s870_s25 + $0x38] sm:$0xff]  ;;  %v267_v16 = vld [vmem:[%s870_s25 + $0x40] sm:$0xff] }
  0x1e   : > { %314 = vst [vmem:[%s891_s7] sm:$0xff] %v298_v4  ;;  %315 = vst [vmem:[%s891_s7 + $0x8] sm:$0xff] %v299_v5  ;;  %v304_v17 = vmul.f32 %v639_v0, %v265_v14  ;;  %v305_v18 = vmul.f32 %v639_v0, %v266_v15  ;;  %v306_v19 = vmul.f32 %v639_v0, %v267_v16  ;;  %v268_v20 = vld [vmem:[%s870_s25 + $0x48] sm:$0xff]  ;;  %v269_v21 = vld [vmem:[%s870_s25 + $0x50] sm:$0xff] }
  0x1f   : > { %316 = vst [vmem:[%s891_s7 + $0x10] sm:$0xff] %v300_v6  ;;  %v270_v22 = vld [vmem:[%s870_s25 + $0x58] sm:$0xff]  ;;  %317 = vst [vmem:[%s891_s7 + $0x18] sm:$0xff] %v301_v11  ;;  %v307_v23 = vmul.f32 %v639_v0, %v268_v20  ;;  %v308_v24 = vmul.f32 %v639_v0, %v269_v21  ;;  %v271_v26 = vld [vmem:[%s870_s25 + $0x60] sm:$0xff] }
  0x20   : > { %318 = vst [vmem:[%s891_s7 + $0x20] sm:$0xff] %v302_v12  ;;  %319 = vst [vmem:[%s891_s7 + $0x28] sm:$0xff] %v303_v13  ;;  %v309_v25 = vmul.f32 %v639_v0, %v270_v22  ;;  %v272_v27 = vld [vmem:[%s870_s25 + $0x68] sm:$0xff]  ;;  %v273_v28 = vld [vmem:[%s870_s25 + $0x70] sm:$0xff]  ;;  %v310_v29 = vmul.f32 %v639_v0, %v271_v26 }
  0x21   : > { %320 = vst [vmem:[%s891_s7 + $0x30] sm:$0xff] %v304_v17  ;;  %321 = vst [vmem:[%s891_s7 + $0x38] sm:$0xff] %v305_v18  ;;  %v311_v30 = vmul.f32 %v639_v0, %v272_v27  ;;  %v312_v31 = vmul.f32 %v639_v0, %v273_v28  ;;  %v274_v32 = vld [vmem:[%s870_s25 + $0x78] sm:$0xff]  ;;  %v275_v33 = vld [vmem:[%s889_s6] sm:$0xff] }
  0x22   : > { %322 = vst [vmem:[%s891_s7 + $0x40] sm:$0xff] %v306_v19  ;;  %v276_v34 = vld [vmem:[%s889_s6 + $0x8] sm:$0xff]  ;;  %323 = vst [vmem:[%s891_s7 + $0x48] sm:$0xff] %v307_v23  ;;  %v313_v35 = vmul.f32 %v639_v0, %v274_v32  ;;  %v337_v36 = vmul.f32 %v881_v10, %v275_v33  ;;  %v277_v38 = vld [vmem:[%s889_s6 + $0x10] sm:$0xff] }
  0x23   : > { %324 = vst [vmem:[%s891_s7 + $0x50] sm:$0xff] %v308_v24  ;;  %325 = vst [vmem:[%s891_s7 + $0x58] sm:$0xff] %v309_v25  ;;  %v338_v37 = vmul.f32 %v881_v10, %v276_v34  ;;  %v278_v39 = vld [vmem:[%s889_s6 + $0x18] sm:$0xff]  ;;  %v279_v40 = vld [vmem:[%s889_s6 + $0x20] sm:$0xff]  ;;  %v339_v41 = vmul.f32 %v881_v10, %v277_v38 }
  0x24   : > { %326 = vst [vmem:[%s891_s7 + $0x60] sm:$0xff] %v310_v29  ;;  %327 = vst [vmem:[%s891_s7 + $0x68] sm:$0xff] %v311_v30  ;;  %v340_v42 = vmul.f32 %v881_v10, %v278_v39  ;;  %v341_v43 = vmul.f32 %v881_v10, %v279_v40  ;;  %v280_v44 = vld [vmem:[%s889_s6 + $0x28] sm:$0xff]  ;;  %v281_v45 = vld [vmem:[%s889_s6 + $0x30] sm:$0xff] }
  0x25   : > { %328 = vst [vmem:[%s891_s7 + $0x70] sm:$0xff] %v312_v31  ;;  %v282_v46 = vld [vmem:[%s889_s6 + $0x38] sm:$0xff]  ;;  %329 = vst [vmem:[%s891_s7 + $0x78] sm:$0xff] %v313_v35  ;;  %v342_v47 = vmul.f32 %v881_v10, %v280_v44  ;;  %v343_v48 = vmul.f32 %v881_v10, %v281_v45  ;;  %v283_v50 = vld [vmem:[%s889_s6 + $0x40] sm:$0xff] }
  0x26   : > { %641 = vst [vmem:[%s891_s7 + $0x80] sm:$0xff] %v337_v36  ;;  %642 = vst [vmem:[%s891_s7 + $0x88] sm:$0xff] %v338_v37  ;;  %v344_v49 = vmul.f32 %v881_v10, %v282_v46  ;;  %v284_v51 = vld [vmem:[%s889_s6 + $0x48] sm:$0xff]  ;;  %v285_v52 = vld [vmem:[%s889_s6 + $0x50] sm:$0xff]  ;;  %v345_v53 = vmul.f32 %v881_v10, %v283_v50 }
  0x27   : > { %643 = vst [vmem:[%s891_s7 + $0x90] sm:$0xff] %v339_v41  ;;  %644 = vst [vmem:[%s891_s7 + $0x98] sm:$0xff] %v340_v42  ;;  %v346_v54 = vmul.f32 %v881_v10, %v284_v51  ;;  %v347_v55 = vmul.f32 %v881_v10, %v285_v52  ;;  %v286_v56 = vld [vmem:[%s889_s6 + $0x58] sm:$0xff]  ;;  %v287_v57 = vld [vmem:[%s889_s6 + $0x60] sm:$0xff]  ;;  %376 = sbr.rel (!%p844_p5) target bundleno = 63 (0x3f), region = 40 }
  0x28   : > { %645 = vst [vmem:[%s891_s7 + $0xa0] sm:$0xff] %v341_v43  ;;  %v288_v58 = vld [vmem:[%s889_s6 + $0x68] sm:$0xff]  ;;  %646 = vst [vmem:[%s891_s7 + $0xa8] sm:$0xff] %v342_v47  ;;  %v348_v59 = vmul.f32 %v881_v10, %v286_v56  ;;  %v349_v60 = vmul.f32 %v881_v10, %v287_v57  ;;  %v289_v62 = vld [vmem:[%s889_s6 + $0x70] sm:$0xff] }
  0x29   : > { %647 = vst [vmem:[%s891_s7 + $0xb0] sm:$0xff] %v343_v48  ;;  %648 = vst [vmem:[%s891_s7 + $0xb8] sm:$0xff] %v344_v49  ;;  %v350_v61 = vmul.f32 %v881_v10, %v288_v58  ;;  %v290_v63 = vld [vmem:[%s889_s6 + $0x78] sm:$0xff]  ;;  %v351_v0 = vmul.f32 %v881_v10, %v289_v62  ;;  %v471_v2 = vld [vmem:[%s891_s7] sm:$0xff] (%p844_p5) }
  0x2a   : > { %649 = vst [vmem:[%s891_s7 + $0xc0] sm:$0xff] %v345_v53  ;;  %650 = vst [vmem:[%s891_s7 + $0xc8] sm:$0xff] %v346_v54  ;;  %v352_v1 = vmul.f32 %v881_v10, %v290_v63  ;;  %v473_v3 = vld [vmem:[%s891_s7 + $0x8] sm:$0xff] (%p844_p5)  ;;  %v475_v4 = vld [vmem:[%s891_s7 + $0x10] sm:$0xff] (%p844_p5) }
  0x2b   : > { %651 = vst [vmem:[%s891_s7 + $0xd0] sm:$0xff] %v347_v55  ;;  %652 = vst [vmem:[%s891_s7 + $0xd8] sm:$0xff] %v348_v59  ;;  %v477_v5 = vld [vmem:[%s891_s7 + $0x18] sm:$0xff] (%p844_p5)  ;;  %v479_v6 = vld [vmem:[%s891_s7 + $0x20] sm:$0xff] (%p844_p5) }
  0x2c   : > { %653 = vst [vmem:[%s891_s7 + $0xe0] sm:$0xff] %v349_v60  ;;  %654 = vst [vmem:[%s891_s7 + $0xe8] sm:$0xff] %v350_v61  ;;  %v481_v7 = vld [vmem:[%s891_s7 + $0x28] sm:$0xff] (%p844_p5)  ;;  %v483_v8 = vld [vmem:[%s891_s7 + $0x30] sm:$0xff] (%p844_p5) }
  0x2d   : > { %655 = vst [vmem:[%s891_s7 + $0xf0] sm:$0xff] %v351_v0  ;;  %656 = vst [vmem:[%s891_s7 + $0xf8] sm:$0xff] %v352_v1  ;;  %v485_v9 = vld [vmem:[%s891_s7 + $0x38] sm:$0xff] (%p844_p5)  ;;  %v487_v10 = vld [vmem:[%s891_s7 + $0x40] sm:$0xff] (%p844_p5) }
  0x2e   : > { %v489_v11 = vld [vmem:[%s891_s7 + $0x48] sm:$0xff]  ;;  %v491_v12 = vld [vmem:[%s891_s7 + $0x50] sm:$0xff]  ;;  %v493_v13 = vld [vmem:[%s891_s7 + $0x58] sm:$0xff]  ;;  %472 = vst [vmem:[%s980_s12] sm:$0xff] %v471_v2 }
  0x2f   : > { %474 = vst [vmem:[%s980_s12 + $0x8] sm:$0xff] %v473_v3  ;;  %476 = vst [vmem:[%s980_s12 + $0x10] sm:$0xff] %v475_v4  ;;  %v495_v14 = vld [vmem:[%s891_s7 + $0x60] sm:$0xff]  ;;  %v497_v15 = vld [vmem:[%s891_s7 + $0x68] sm:$0xff] }
  0x30   : > { %478 = vst [vmem:[%s980_s12 + $0x18] sm:$0xff] %v477_v5  ;;  %480 = vst [vmem:[%s980_s12 + $0x20] sm:$0xff] %v479_v6  ;;  %v499_v16 = vld [vmem:[%s891_s7 + $0x70] sm:$0xff]  ;;  %v501_v17 = vld [vmem:[%s891_s7 + $0x78] sm:$0xff] }
  0x31   : > { %482 = vst [vmem:[%s980_s12 + $0x28] sm:$0xff] %v481_v7  ;;  %484 = vst [vmem:[%s980_s12 + $0x30] sm:$0xff] %v483_v8  ;;  %v503_v18 = vld [vmem:[%s891_s7 + $0x80] sm:$0xff]  ;;  %v505_v19 = vld [vmem:[%s891_s7 + $0x88] sm:$0xff] }
  0x32   : > { %486 = vst [vmem:[%s980_s12 + $0x38] sm:$0xff] %v485_v9  ;;  %488 = vst [vmem:[%s980_s12 + $0x40] sm:$0xff] %v487_v10  ;;  %v507_v20 = vld [vmem:[%s891_s7 + $0x90] sm:$0xff]  ;;  %v509_v21 = vld [vmem:[%s891_s7 + $0x98] sm:$0xff] }
  0x33   : > { %490 = vst [vmem:[%s980_s12 + $0x48] sm:$0xff] %v489_v11  ;;  %492 = vst [vmem:[%s980_s12 + $0x50] sm:$0xff] %v491_v12  ;;  %v511_v22 = vld [vmem:[%s891_s7 + $0xa0] sm:$0xff]  ;;  %v513_v23 = vld [vmem:[%s891_s7 + $0xa8] sm:$0xff] }
  0x34   : > { %494 = vst [vmem:[%s980_s12 + $0x58] sm:$0xff] %v493_v13  ;;  %496 = vst [vmem:[%s980_s12 + $0x60] sm:$0xff] %v495_v14  ;;  %v515_v24 = vld [vmem:[%s891_s7 + $0xb0] sm:$0xff]  ;;  %v517_v25 = vld [vmem:[%s891_s7 + $0xb8] sm:$0xff] }
  0x35   : > { %498 = vst [vmem:[%s980_s12 + $0x68] sm:$0xff] %v497_v15  ;;  %500 = vst [vmem:[%s980_s12 + $0x70] sm:$0xff] %v499_v16  ;;  %v519_v26 = vld [vmem:[%s891_s7 + $0xc0] sm:$0xff]  ;;  %v521_v27 = vld [vmem:[%s891_s7 + $0xc8] sm:$0xff] }
  0x36   : > { %502 = vst [vmem:[%s980_s12 + $0x78] sm:$0xff] %v501_v17  ;;  %504 = vst [vmem:[%s980_s12 + $0x100] sm:$0xff] %v503_v18  ;;  %v523_v28 = vld [vmem:[%s891_s7 + $0xd0] sm:$0xff]  ;;  %v525_v29 = vld [vmem:[%s891_s7 + $0xd8] sm:$0xff] }
  0x37   : > { %506 = vst [vmem:[%s980_s12 + $0x108] sm:$0xff] %v505_v19  ;;  %508 = vst [vmem:[%s980_s12 + $0x110] sm:$0xff] %v507_v20  ;;  %v527_v30 = vld [vmem:[%s891_s7 + $0xe0] sm:$0xff]  ;;  %v529_v31 = vld [vmem:[%s891_s7 + $0xe8] sm:$0xff] }
  0x38   : > { %510 = vst [vmem:[%s980_s12 + $0x118] sm:$0xff] %v509_v21  ;;  %512 = vst [vmem:[%s980_s12 + $0x120] sm:$0xff] %v511_v22  ;;  %v531_v32 = vld [vmem:[%s891_s7 + $0xf0] sm:$0xff]  ;;  %v533_v33 = vld [vmem:[%s891_s7 + $0xf8] sm:$0xff] }
  0x39   : > { %514 = vst [vmem:[%s980_s12 + $0x128] sm:$0xff] %v513_v23  ;;  %516 = vst [vmem:[%s980_s12 + $0x130] sm:$0xff] %v515_v24 }
  0x3a   : > { %518 = vst [vmem:[%s980_s12 + $0x138] sm:$0xff] %v517_v25  ;;  %520 = vst [vmem:[%s980_s12 + $0x140] sm:$0xff] %v519_v26 }
  0x3b   : > { %522 = vst [vmem:[%s980_s12 + $0x148] sm:$0xff] %v521_v27  ;;  %524 = vst [vmem:[%s980_s12 + $0x150] sm:$0xff] %v523_v28 }
  0x3c   : > { %526 = vst [vmem:[%s980_s12 + $0x158] sm:$0xff] %v525_v29  ;;  %528 = vst [vmem:[%s980_s12 + $0x160] sm:$0xff] %v527_v30 }
  0x3d   : > { %530 = vst [vmem:[%s980_s12 + $0x168] sm:$0xff] %v529_v31  ;;  %532 = vst [vmem:[%s980_s12 + $0x170] sm:$0xff] %v531_v32 }
  0x3e   : > { %534 = vst [vmem:[%s980_s12 + $0x178] sm:$0xff] %v533_v33 }
  0x3f PF: > { %s14_s21 = sadd.s32 1, %s773_s21   ;;  %s1064_s15 = smov %s753_s16 }
  0x40   : > { %p11_p11 = scmp.ge.s32.totalorder %s14_s21, 6   ;;  %s1065_s16 = smov %s855_s30 }
  0x41   : > { %s1066_s17 = smov %s765_s19  ;;  %s1067_s18 = smov %s769_s20 }
  0x42   : > { %s1068_s19 = smov %s1071_s22  ;;  %s1069_s20 = smov %s1075_s23 }
  0x43   :  { %13 = sbr.rel (!%p11_p11) target bundleno = 4 (0x4), region = 108 }

</bundles_post_ra>
